<compile_context>
chip_gen: v5e
topology: v5e:2x2
jax: 0.10.0
libtpu: 0.0.40
codegen_flags: <defaults>
</compile_context>

<pallas_src>
import functools

import jax
import jax.numpy as jnp
from jax.experimental import pallas as pl
from jax.experimental.pallas import tpu as pltpu

_LANE = 128


def _round_up(n, m):
    return ((n + m - 1) // m) * m


def _padded_dim(d):
    # Pad to a multiple of 128 only for lane-sized dims; tiny dims keep their true width
    # (full-extent blocks are legal and avoid inflating HBM traffic for zero benefit).
    return _round_up(d, _LANE) if d >= _LANE else d


def _vmem_budget_bytes():
    # Generation-aware budget: ~96 MiB on v5e/v6e (128 MiB physical), ~48 MiB on v7x (64 MiB).
    try:
        cap = int(pltpu.get_tpu_info().vmem_capacity_bytes)
    except Exception:
        cap = 64 * 1024 * 1024  # conservative fallback: assume v7x-sized VMEM
    return max(int(cap * 0.75), 32 * 1024 * 1024)


def _autoencoder_kernel(x_ref, w1_ref, b1_ref, w2_ref, b2_ref, o_ref):
    # Encoder: h = relu(x @ W1 + b1).  MXU accumulates in f32; bias add / ReLU in f32.
    h = jnp.dot(x_ref[...], w1_ref[...], preferred_element_type=jnp.float32)
    h = jnp.maximum(h + b1_ref[...].astype(jnp.float32), 0.0)
    # Decoder: y = relu(h @ W2 + b2).  Hidden activation never leaves VMEM.
    y = jnp.dot(h.astype(w2_ref.dtype), w2_ref[...], preferred_element_type=jnp.float32)
    y = jnp.maximum(y + b2_ref[...].astype(jnp.float32), 0.0)
    o_ref[...] = y.astype(o_ref.dtype)


def prepare_params(w1, b1, w2, b2):
    """One-time parameter prep (keep OUT of the per-call path).

    w1: [D, H], b1: [H], w2: [H, D], b2: [D] in math layout.  Pads feature dims to
    lane-friendly shapes (only when >= 128) and reshapes biases to row vectors.
    Padded rows/cols are zero, so the math stays exact.
    """
    D, H = w1.shape
    Dp, Hp = _padded_dim(D), _padded_dim(H)
    w1p = jnp.pad(w1, ((0, Dp - D), (0, Hp - H)))
    w2p = jnp.pad(w2, ((0, Hp - H), (0, Dp - D)))
    b1p = jnp.pad(jnp.reshape(b1, (1, H)), ((0, 0), (0, Hp - H)))
    b2p = jnp.pad(jnp.reshape(b2, (1, D)), ((0, 0), (0, Dp - D)))
    return w1p, b1p, w2p, b2p


@functools.partial(jax.jit, static_argnames=("block_batch", "resident_weights"))
def _forward(x, w1p, b1p, w2p, b2p, *, block_batch, resident_weights):
    B, D = x.shape
    Dp, Hp = w1p.shape
    dtype = x.dtype
    itemsize = jnp.dtype(dtype).itemsize
    sublane = max(8, 32 // itemsize)  # dtype-aware: 8 f32 / 16 bf16 / 32 int8

    # Only pad x's feature dim when the params were padded (D >= 128 and not a multiple
    # of 128); for small D the kernel runs at the true width with zero wrapper copies.
    if Dp != D:
        x = jnp.pad(x, ((0, 0), (0, Dp - D)))

    budget = _vmem_budget_bytes()

    def vmem_needed(tb):
        weights = (Dp * Hp + Hp * Dp + Hp + Dp) * itemsize  # single-buffered residents
        io = 2 * 2 * tb * Dp * itemsize                     # x + out tiles, double-buffered
        interm = tb * (Hp + Dp) * 4                         # f32 intermediates in the body
        return weights + io + interm

    # Batch tile: as large as the budget allows, sublane-aligned, capped so the grid has
    # >= 2 steps when the batch allows it (lets "parallel" use both v7x TensorCores).
    TB = min(_round_up(block_batch, sublane), _round_up(B, sublane))
    if B >= 2 * sublane:
        TB = min(TB, _round_up(pl.cdiv(B, 2), sublane))
    while TB > sublane and vmem_needed(TB) > budget:
        TB = _round_up(TB // 2, sublane)  # stays a sublane multiple; never bumps above budget
    if TB >= B:
        TB = B  # single exact block: block dim == full array dim is always legal

    grid = (pl.cdiv(B, TB),)  # ragged last tile is masked by Pallas; no batch padding
    vmem_limit = int(min(budget, max(vmem_needed(TB) * 1.25, 32 * 1024 * 1024)))

    if resident_weights:
        # Whole-array VMEM operands: fetched once, single-buffered, resident across steps.
        w1_spec = pl.BlockSpec(memory_space=pltpu.MemorySpace.VMEM)
        b1_spec = pl.BlockSpec(memory_space=pltpu.MemorySpace.VMEM)
        w2_spec = pl.BlockSpec(memory_space=pltpu.MemorySpace.VMEM)
        b2_spec = pl.BlockSpec(memory_space=pltpu.MemorySpace.VMEM)
    else:
        # Fallback: constant index maps (fetched once, but runtime double-buffers them).
        w1_spec = pl.BlockSpec((Dp, Hp), lambda i: (0, 0))
        b1_spec = pl.BlockSpec((1, Hp), lambda i: (0, 0))
        w2_spec = pl.BlockSpec((Hp, Dp), lambda i: (0, 0))
        b2_spec = pl.BlockSpec((1, Dp), lambda i: (0, 0))

    cost = pl.CostEstimate(
        flops=2 * B * (Dp * Hp + Hp * Dp),
        transcendentals=0,
        bytes_accessed=(2 * B * Dp + 2 * Dp * Hp + Hp + Dp) * itemsize,
    )

    out = pl.pallas_call(
        _autoencoder_kernel,
        out_shape=jax.ShapeDtypeStruct((B, Dp), dtype),
        grid=grid,
        in_specs=[
            pl.BlockSpec((TB, Dp), lambda i: (i, 0)),  # x: streamed over batch tiles
            w1_spec, b1_spec, w2_spec, b2_spec,        # params: VMEM-resident
        ],
        out_specs=pl.BlockSpec((TB, Dp), lambda i: (i, 0)),
        compiler_params=pltpu.CompilerParams(
            dimension_semantics=("parallel",),
            vmem_limit_bytes=vmem_limit,
        ),
        cost_estimate=cost,
    )(x, w1p, b1p, w2p, b2p)

    return out if Dp == D else out[:, :D]


def traffic_autoencoder(x, w1p, b1p, w2p, b2p, *, block_batch=512):
    """Forward pass of TrafficAutoEncoder.  x: [B, D]; params from prepare_params()."""
    try:
        return _forward(x, w1p, b1p, w2p, b2p,
                        block_batch=block_batch, resident_weights=True)
    except Exception:
        # Graceful degradation for Pallas versions that reject whole-array VMEM operands.
        return _forward(x, w1p, b1p, w2p, b2p,
                        block_batch=block_batch, resident_weights=False)


def init_params(key, input_size, hidden_size, dtype=jnp.float32):
    """Deterministic init mimicking nn.Linear's U(-1/sqrt(fan_in), 1/sqrt(fan_in))."""
    k1, k2, k3, k4 = jax.random.split(key, 4)
    bound1 = 1.0 / (input_size ** 0.5)
    bound2 = 1.0 / (hidden_size ** 0.5)
    # Stored as (in_features, out_features) == transpose of PyTorch's (out, in).
    w1 = jax.random.uniform(k1, (input_size, hidden_size), dtype, -bound1, bound1)
    b1 = jax.random.uniform(k2, (hidden_size,), dtype, -bound1, bound1)
    w2 = jax.random.uniform(k3, (hidden_size, input_size), dtype, -bound2, bound2)
    b2 = jax.random.uniform(k4, (input_size,), dtype, -bound2, bound2)
    return w1, b1, w2, b2


def reference_forward(x, w1, b1, w2, b2):
    h = jnp.maximum(x @ w1 + b1, 0.0)
    return jnp.maximum(h @ w2 + b2, 0.0)


if __name__ == "__main__":
    input_size = 16
    hidden_size = 32

    key = jax.random.PRNGKey(0)
    kx, kp, kx2 = jax.random.split(key, 3)
    w1, b1, w2, b2 = init_params(kp, input_size, hidden_size)
    params = prepare_params(w1, b1, w2, b2)  # one-time prep, outside the per-call path

    # Small config matching the spec (batch=2, input_size=16, hidden=32).
    x = jax.random.uniform(kx, (2, input_size), jnp.float32)
    out = jax.block_until_ready(traffic_autoencoder(x, *params))
    ref = reference_forward(x, w1, b1, w2, b2)
    assert out.shape == (2, input_size)
    assert jnp.allclose(out, ref, atol=1e-5, rtol=1e-5)

    # Ragged batch exercising a multi-step grid with a masked partial last tile.
    x2 = jax.random.uniform(kx2, (20, input_size), jnp.float32)
    out2 = jax.block_until_ready(traffic_autoencoder(x2, *params, block_batch=8))
    ref2 = reference_forward(x2, w1, b1, w2, b2)
    assert out2.shape == (20, input_size)
    assert jnp.allclose(out2, ref2, atol=1e-5, rtol=1e-5)

    print("KERNEL_OK")
</pallas_src>

<mosaic_0001>
module attributes {stable_mosaic.version = 11 : i64} {
  func.func @_autoencoder_kernel(%arg0: i32, %arg1: memref<2x16xf32, #tpu.memory_space<vmem>>, %arg2: memref<16x32xf32, #tpu.memory_space<vmem>>, %arg3: memref<1x32xf32, #tpu.memory_space<vmem>>, %arg4: memref<32x16xf32, #tpu.memory_space<vmem>>, %arg5: memref<1x16xf32, #tpu.memory_space<vmem>>, %arg6: memref<2x16xf32, #tpu.memory_space<vmem>>) attributes {dimension_semantics = [#tpu.dimension_semantics<parallel>], iteration_bounds = array<i64: 1>, scalar_prefetch = 0 : i64, scratch_operands = 0 : i64, tpu.core_type = #tpu.core_type<tc>, window_params = [{transform_indices = @transform_0, window_bounds = array<i64: 2, 16>}, {pipeline_mode = #tpu.pipeline_mode<synchronous>, transform_indices = @transform_1, window_bounds = array<i64: 16, 32>}, {pipeline_mode = #tpu.pipeline_mode<synchronous>, transform_indices = @transform_2, window_bounds = array<i64: 1, 32>}, {pipeline_mode = #tpu.pipeline_mode<synchronous>, transform_indices = @transform_3, window_bounds = array<i64: 32, 16>}, {pipeline_mode = #tpu.pipeline_mode<synchronous>, transform_indices = @transform_4, window_bounds = array<i64: 1, 16>}, {transform_indices = @transform_5, window_bounds = array<i64: 2, 16>}]} {
    %c0 = arith.constant 0 : index
    %c0_0 = arith.constant 0 : index
    %0 = vector.load %arg1[%c0, %c0_0] : memref<2x16xf32, #tpu.memory_space<vmem>>, vector<2x16xf32>
    %c0_1 = arith.constant 0 : index
    %c0_2 = arith.constant 0 : index
    %1 = vector.load %arg2[%c0_1, %c0_2] : memref<16x32xf32, #tpu.memory_space<vmem>>, vector<16x32xf32>
    %cst = arith.constant dense<0.000000e+00> : vector<2x32xf32>
    %2 = tpu.matmul %0, %1, %cst {dimension_numbers = #tpu.dot_dimension_numbers<[1], [0], [0], [1], [0, 0, 1, 1], [], []>} : vector<2x16xf32>, vector<16x32xf32>, vector<2x32xf32> -> vector<2x32xf32>
    %c0_3 = arith.constant 0 : index
    %c0_4 = arith.constant 0 : index
    %3 = vector.load %arg3[%c0_3, %c0_4] : memref<1x32xf32, #tpu.memory_space<vmem>>, vector<1x32xf32>
    %4 = vector.broadcast %3 : vector<1x32xf32> to vector<2x32xf32>
    %5 = arith.addf %2, %4 : vector<2x32xf32>
    %cst_5 = arith.constant 0.000000e+00 : f32
    %6 = vector.broadcast %cst_5 : f32 to vector<2x32xf32>
    %7 = arith.maximumf %5, %6 : vector<2x32xf32>
    %c0_6 = arith.constant 0 : index
    %c0_7 = arith.constant 0 : index
    %8 = vector.load %arg4[%c0_6, %c0_7] : memref<32x16xf32, #tpu.memory_space<vmem>>, vector<32x16xf32>
    %cst_8 = arith.constant dense<0.000000e+00> : vector<2x16xf32>
    %9 = tpu.matmul %7, %8, %cst_8 {dimension_numbers = #tpu.dot_dimension_numbers<[1], [0], [0], [1], [0, 0, 1, 1], [], []>} : vector<2x32xf32>, vector<32x16xf32>, vector<2x16xf32> -> vector<2x16xf32>
    %c0_9 = arith.constant 0 : index
    %c0_10 = arith.constant 0 : index
    %10 = vector.load %arg5[%c0_9, %c0_10] : memref<1x16xf32, #tpu.memory_space<vmem>>, vector<1x16xf32>
    %11 = vector.broadcast %10 : vector<1x16xf32> to vector<2x16xf32>
    %12 = arith.addf %9, %11 : vector<2x16xf32>
    %cst_11 = arith.constant 0.000000e+00 : f32
    %13 = vector.broadcast %cst_11 : f32 to vector<2x16xf32>
    %14 = arith.maximumf %12, %13 : vector<2x16xf32>
    %c0_12 = arith.constant 0 : index
    %c0_13 = arith.constant 0 : index
    %15 = vector.load %arg6[%c0_12, %c0_13] : memref<2x16xf32, #tpu.memory_space<vmem>>, vector<2x16xf32>
    tpu.vector_store %arg6[%c0_12, %c0_13], %14 {strides = array<i32>} : memref<2x16xf32, #tpu.memory_space<vmem>>, vector<2x16xf32>,
    return
  }
  func.func @transform_0(%arg0: i32) -> (i32, i32) {
    %c0_i32 = arith.constant 0 : i32
    %c0_i32_0 = arith.constant 0 : i32
    return %arg0, %c0_i32 : i32, i32
  }
  func.func @transform_1(%arg0: i32) -> (i32, i32) {
    %c0_i32 = arith.constant 0 : i32
    %c0_i32_0 = arith.constant 0 : i32
    %c0_i32_1 = arith.constant 0 : i32
    return %c0_i32, %c0_i32_0 : i32, i32
  }
  func.func @transform_2(%arg0: i32) -> (i32, i32) {
    %c0_i32 = arith.constant 0 : i32
    %c0_i32_0 = arith.constant 0 : i32
    %c0_i32_1 = arith.constant 0 : i32
    return %c0_i32, %c0_i32_0 : i32, i32
  }
  func.func @transform_3(%arg0: i32) -> (i32, i32) {
    %c0_i32 = arith.constant 0 : i32
    %c0_i32_0 = arith.constant 0 : i32
    %c0_i32_1 = arith.constant 0 : i32
    return %c0_i32, %c0_i32_0 : i32, i32
  }
  func.func @transform_4(%arg0: i32) -> (i32, i32) {
    %c0_i32 = arith.constant 0 : i32
    %c0_i32_0 = arith.constant 0 : i32
    %c0_i32_1 = arith.constant 0 : i32
    return %c0_i32, %c0_i32_0 : i32, i32
  }
  func.func @transform_5(%arg0: i32) -> (i32, i32) {
    %c0_i32 = arith.constant 0 : i32
    %c0_i32_0 = arith.constant 0 : i32
    return %arg0, %c0_i32 : i32, i32
  }
}

module attributes {stable_mosaic.version = 11 : i64} {
  func.func @_autoencoder_kernel(%arg0: i32, %arg1: memref<2x16xf32, #tpu.memory_space<vmem>>, %arg2: memref<16x32xf32, #tpu.memory_space<vmem>>, %arg3: memref<1x32xf32, #tpu.memory_space<vmem>>, %arg4: memref<32x16xf32, #tpu.memory_space<vmem>>, %arg5: memref<1x16xf32, #tpu.memory_space<vmem>>, %arg6: memref<2x16xf32, #tpu.memory_space<vmem>>) attributes {dimension_semantics = [#tpu.dimension_semantics<parallel>], iteration_bounds = array<i64: 1>, scalar_prefetch = 0 : i64, scratch_operands = 0 : i64, tpu.core_type = #tpu.core_type<tc>, window_params = [{transform_indices = @transform_0, window_bounds = array<i64: 2, 16>}, {pipeline_mode = #tpu.pipeline_mode<synchronous>, transform_indices = @transform_1, window_bounds = array<i64: 16, 32>}, {pipeline_mode = #tpu.pipeline_mode<synchronous>, transform_indices = @transform_2, window_bounds = array<i64: 1, 32>}, {pipeline_mode = #tpu.pipeline_mode<synchronous>, transform_indices = @transform_3, window_bounds = array<i64: 32, 16>}, {pipeline_mode = #tpu.pipeline_mode<synchronous>, transform_indices = @transform_4, window_bounds = array<i64: 1, 16>}, {transform_indices = @transform_5, window_bounds = array<i64: 2, 16>}]} {
    %c0 = arith.constant 0 : index
    %c0_0 = arith.constant 0 : index
    %0 = vector.load %arg1[%c0, %c0_0] : memref<2x16xf32, #tpu.memory_space<vmem>>, vector<2x16xf32>
    %c0_1 = arith.constant 0 : index
    %c0_2 = arith.constant 0 : index
    %1 = vector.load %arg2[%c0_1, %c0_2] : memref<16x32xf32, #tpu.memory_space<vmem>>, vector<16x32xf32>
    %cst = arith.constant dense<0.000000e+00> : vector<2x32xf32>
    %2 = tpu.matmul %0, %1, %cst {dimension_numbers = #tpu.dot_dimension_numbers<[1], [0], [0], [1], [0, 0, 1, 1], [], []>} : vector<2x16xf32>, vector<16x32xf32>, vector<2x32xf32> -> vector<2x32xf32>
    %c0_3 = arith.constant 0 : index
    %c0_4 = arith.constant 0 : index
    %3 = vector.load %arg3[%c0_3, %c0_4] : memref<1x32xf32, #tpu.memory_space<vmem>>, vector<1x32xf32>
    %4 = vector.broadcast %3 : vector<1x32xf32> to vector<2x32xf32>
    %5 = arith.addf %2, %4 : vector<2x32xf32>
    %cst_5 = arith.constant 0.000000e+00 : f32
    %6 = vector.broadcast %cst_5 : f32 to vector<2x32xf32>
    %7 = arith.maximumf %5, %6 : vector<2x32xf32>
    %c0_6 = arith.constant 0 : index
    %c0_7 = arith.constant 0 : index
    %8 = vector.load %arg4[%c0_6, %c0_7] : memref<32x16xf32, #tpu.memory_space<vmem>>, vector<32x16xf32>
    %cst_8 = arith.constant dense<0.000000e+00> : vector<2x16xf32>
    %9 = tpu.matmul %7, %8, %cst_8 {dimension_numbers = #tpu.dot_dimension_numbers<[1], [0], [0], [1], [0, 0, 1, 1], [], []>} : vector<2x32xf32>, vector<32x16xf32>, vector<2x16xf32> -> vector<2x16xf32>
    %c0_9 = arith.constant 0 : index
    %c0_10 = arith.constant 0 : index
    %10 = vector.load %arg5[%c0_9, %c0_10] : memref<1x16xf32, #tpu.memory_space<vmem>>, vector<1x16xf32>
    %11 = vector.broadcast %10 : vector<1x16xf32> to vector<2x16xf32>
    %12 = arith.addf %9, %11 : vector<2x16xf32>
    %cst_11 = arith.constant 0.000000e+00 : f32
    %13 = vector.broadcast %cst_11 : f32 to vector<2x16xf32>
    %14 = arith.maximumf %12, %13 : vector<2x16xf32>
    %c0_12 = arith.constant 0 : index
    %c0_13 = arith.constant 0 : index
    %15 = vector.load %arg6[%c0_12, %c0_13] : memref<2x16xf32, #tpu.memory_space<vmem>>, vector<2x16xf32>
    tpu.vector_store %arg6[%c0_12, %c0_13], %14 {strides = array<i32>} : memref<2x16xf32, #tpu.memory_space<vmem>>, vector<2x16xf32>,
    return
  }
  func.func @transform_0(%arg0: i32) -> (i32, i32) {
    %c0_i32 = arith.constant 0 : i32
    %c0_i32_0 = arith.constant 0 : i32
    return %arg0, %c0_i32 : i32, i32
  }
  func.func @transform_1(%arg0: i32) -> (i32, i32) {
    %c0_i32 = arith.constant 0 : i32
    %c0_i32_0 = arith.constant 0 : i32
    %c0_i32_1 = arith.constant 0 : i32
    return %c0_i32, %c0_i32_0 : i32, i32
  }
  func.func @transform_2(%arg0: i32) -> (i32, i32) {
    %c0_i32 = arith.constant 0 : i32
    %c0_i32_0 = arith.constant 0 : i32
    %c0_i32_1 = arith.constant 0 : i32
    return %c0_i32, %c0_i32_0 : i32, i32
  }
  func.func @transform_3(%arg0: i32) -> (i32, i32) {
    %c0_i32 = arith.constant 0 : i32
    %c0_i32_0 = arith.constant 0 : i32
    %c0_i32_1 = arith.constant 0 : i32
    return %c0_i32, %c0_i32_0 : i32, i32
  }
  func.func @transform_4(%arg0: i32) -> (i32, i32) {
    %c0_i32 = arith.constant 0 : i32
    %c0_i32_0 = arith.constant 0 : i32
    %c0_i32_1 = arith.constant 0 : i32
    return %c0_i32, %c0_i32_0 : i32, i32
  }
  func.func @transform_5(%arg0: i32) -> (i32, i32) {
    %c0_i32 = arith.constant 0 : i32
    %c0_i32_0 = arith.constant 0 : i32
    return %arg0, %c0_i32 : i32, i32
  }
}

</mosaic_0001>

<bundles_post_ra>
// kernel: _forward.1
= control target key start
LH: loop header
LB: loop body
LE: loop exit
PB: predicated region body
PF: predicated region fallthrough
CT: control target
= control target key end

     0   :  { %vm28_vm0 = vcmask 130048   ;;  %s196_s0 = inlined_call_operand.vmem [shape: f32[2,16], index: 0, kind: input, shape index: {}]   ;;  %s197_s1 = inlined_call_operand.vmem [shape: f32[16,32], index: 1, kind: input, shape index: {}]   ;;  %s198_s2 = inlined_call_operand.vmem [shape: f32[1,32], index: 2, kind: input, shape index: {}]   ;;  %s199_s3 = inlined_call_operand.vmem [shape: f32[32,16], index: 3, kind: input, shape index: {}]   ;;  %s200_s4 = inlined_call_operand.vmem [shape: f32[1,16], index: 4, kind: input, shape index: {}]   ;;  %s201_s5 = inlined_call_operand.hbm [shape: f32[2,16], index: 5, kind: output, shape index: {}]  }
   0x1   :  { %v23_v0 = vld [vmem:[%s197_s1 + $0x8] sm:$0xff]  ;;  %v22_v1 = vld [vmem:[%s197_s1] sm:$0xff]  ;;  %v56_v3 = vld [vmem:[%s199_s3 + $0x18] sm:$0xff] }
   0x2   :  { %46 = vmatpush.msra.mxu0 %v23_v0  ;;  %v21_v2 = vld [vmem:[%s196_s0] sm:$0x3]  ;;  %77 = vmatpush.msra.mxu1 %v56_v3 }
   0x3   :  { %10 = vsyncpa [#allocation3], 0  ;;  %v55_v4 = vld [vmem:[%s199_s3 + $0x10] sm:$0xff]  ;;  %v54_v5 = vld [vmem:[%s199_s3 + $0x8] sm:$0xff]  ;;  %vm61_vm1 = vcmask 261120   ;;  %s135_s9 = smov [#allocation2]  }
   0x4   :  { %47 = vmatpush.msra.mxu0 %v22_v1  ;;  %78 = vmatpush.msra.mxu1 %v55_v4  ;;  %v53_v6 = vld [vmem:[%s199_s3] sm:$0xff]  ;;  %s93_s10 = sshll.u32 %s135_s9, 4  ;;  %s95_s3 = sshll.u32 %s201_s5, 4  ;;  %vm86_vm2 = vcmask 123904   ;;  %s94_s10 = int_to_ptr.vmem [resolvable:$true] %s93_s10  ;;  %s96_s3 = int_to_ptr.hbm [resolvable:$true] %s95_s3 }
   0x5   :  { %104 = vmatmul.msk.f32.vlgmr.msra.gmra.mxu0 %vm28_vm0, %v21_v2  ;;  %v107_v7 = vld [vmem:[%s198_s2] ss:$0 sm:$0xff] }
   0x6   :  { %79 = vmatpush.msra.mxu1 %v54_v5  ;;  %v108_v11 = vld [vmem:[%s200_s4] ss:$0 sm:$0xff] }
   0x8   :  { %80 = vmatpush.msra.mxu1 %v53_v6 }
  0x82   :  { %v49_v8 = vpop.f32.mrf.mxu0 }
  0x83   :  { %v50_v9 = vadd.f32 %v107_v7, %v49_v8 }
  0x85   :  { %v52_v10 = vmax.f32 %v50_v9, 0.0 }
  0x87   :  { %105 = vmatmul.msk.f32.vlgmr.msra.gmra.mxu1 %vm61_vm1, %v52_v10 }
 0x104   :  { %v82_v12 = vpop.f32.mrf.mxu1 }
 0x105   :  { %v83_v13 = vadd.f32 %v108_v11, %v82_v12 }
 0x107   :  { %v85_v14 = vmax.f32 %v83_v13, 0.0 }
 0x109   :  { %87 = vst.msk [vmem:[#allocation2] sm:$0x3] %vm86_vm2, %v85_v14 }
 0x10a   :  { %98 = dma.vmem_to_hbm [thread:$0]  %s94_s10, 32, %s96_s3, [#allocation3]  }
 0x10b   :  { %133 = dma.done.wait [#allocation3], 32  }
 0x10c   :  { %134 = vsyncadd [#allocation3], 4294967264 }
 0x10d   :  { %103 = vsyncpa [#allocation3], 1 }

// kernel: _forward.1
= control target key start
LH: loop header
LB: loop body
LE: loop exit
PB: predicated region body
PF: predicated region fallthrough
CT: control target
= control target key end

     0   :  { %vm28_vm0 = vcmask 130048   ;;  %s196_s0 = inlined_call_operand.vmem [shape: f32[2,16], index: 0, kind: input, shape index: {}]   ;;  %s197_s1 = inlined_call_operand.vmem [shape: f32[16,32], index: 1, kind: input, shape index: {}]   ;;  %s198_s2 = inlined_call_operand.vmem [shape: f32[1,32], index: 2, kind: input, shape index: {}]   ;;  %s199_s3 = inlined_call_operand.vmem [shape: f32[32,16], index: 3, kind: input, shape index: {}]   ;;  %s200_s4 = inlined_call_operand.vmem [shape: f32[1,16], index: 4, kind: input, shape index: {}]   ;;  %s201_s5 = inlined_call_operand.hbm [shape: f32[2,16], index: 5, kind: output, shape index: {}]  }
   0x1   :  { %v23_v0 = vld [vmem:[%s197_s1 + $0x8] sm:$0xff]  ;;  %v22_v1 = vld [vmem:[%s197_s1] sm:$0xff]  ;;  %v56_v3 = vld [vmem:[%s199_s3 + $0x18] sm:$0xff] }
   0x2   :  { %46 = vmatpush.msra.mxu0 %v23_v0  ;;  %v21_v2 = vld [vmem:[%s196_s0] sm:$0x3]  ;;  %77 = vmatpush.msra.mxu1 %v56_v3 }
   0x3   :  { %10 = vsyncpa [#allocation3], 0  ;;  %v55_v4 = vld [vmem:[%s199_s3 + $0x10] sm:$0xff]  ;;  %v54_v5 = vld [vmem:[%s199_s3 + $0x8] sm:$0xff]  ;;  %vm61_vm1 = vcmask 261120   ;;  %s135_s9 = smov [#allocation2]  }
   0x4   :  { %47 = vmatpush.msra.mxu0 %v22_v1  ;;  %78 = vmatpush.msra.mxu1 %v55_v4  ;;  %v53_v6 = vld [vmem:[%s199_s3] sm:$0xff]  ;;  %s93_s10 = sshll.u32 %s135_s9, 4  ;;  %s95_s3 = sshll.u32 %s201_s5, 4  ;;  %vm86_vm2 = vcmask 123904   ;;  %s94_s10 = int_to_ptr.vmem [resolvable:$true] %s93_s10  ;;  %s96_s3 = int_to_ptr.hbm [resolvable:$true] %s95_s3 }
   0x5   :  { %104 = vmatmul.msk.f32.vlgmr.msra.gmra.mxu0 %vm28_vm0, %v21_v2  ;;  %v107_v7 = vld [vmem:[%s198_s2] ss:$0 sm:$0xff] }
   0x6   :  { %79 = vmatpush.msra.mxu1 %v54_v5  ;;  %v108_v11 = vld [vmem:[%s200_s4] ss:$0 sm:$0xff] }
   0x8   :  { %80 = vmatpush.msra.mxu1 %v53_v6 }
  0x82   :  { %v49_v8 = vpop.f32.mrf.mxu0 }
  0x83   :  { %v50_v9 = vadd.f32 %v107_v7, %v49_v8 }
  0x85   :  { %v52_v10 = vmax.f32 %v50_v9, 0.0 }
  0x87   :  { %105 = vmatmul.msk.f32.vlgmr.msra.gmra.mxu1 %vm61_vm1, %v52_v10 }
 0x104   :  { %v82_v12 = vpop.f32.mrf.mxu1 }
 0x105   :  { %v83_v13 = vadd.f32 %v108_v11, %v82_v12 }
 0x107   :  { %v85_v14 = vmax.f32 %v83_v13, 0.0 }
 0x109   :  { %87 = vst.msk [vmem:[#allocation2] sm:$0x3] %vm86_vm2, %v85_v14 }
 0x10a   :  { %98 = dma.vmem_to_hbm [thread:$0]  %s94_s10, 32, %s96_s3, [#allocation3]  }
 0x10b   :  { %133 = dma.done.wait [#allocation3], 32  }
 0x10c   :  { %134 = vsyncadd [#allocation3], 4294967264 }
 0x10d   :  { %103 = vsyncpa [#allocation3], 1 }

</bundles_post_ra>
